<compile_context>
chip_gen: v7x
topology: tpu7x:2x2x1
jax: 0.10.0
libtpu: 0.0.40
codegen_flags: <defaults>
</compile_context>

<pallas_src>
import functools

import jax
import jax.numpy as jnp
from jax.experimental import pallas as pl
from jax.experimental.pallas import tpu as pltpu


def _round_up(n, m):
    return ((n + m - 1) // m) * m


# ----------------------------- Pallas kernel ------------------------------ #
def _actor_mlp_kernel(
    x_ref,
    we1_ref, be1_ref,
    we2_ref, be2_ref,
    wa1_ref, ba1_ref,
    wa2_ref, ba2_ref,
    wa3_ref, ba3_ref,
    o_ref,
    *, extero_dim, tanh_dtype,
):
    bf16 = jnp.bfloat16

    def act(z_f32):
        # matmul(+bias) result is f32; activation in tanh_dtype (bf16 on v6e/v7x),
        # result kept in bf16 for the next MXU op.
        return jnp.tanh(z_f32.astype(tanh_dtype)).astype(bf16)

    xb = x_ref[...].astype(bf16)                                   # (TB, E+P)

    # ---- extero branch (the extero/proprio split is folded into we1: its
    #      proprio rows are zero, so the full x can be used directly) ----
    h = act(jnp.dot(xb, we1_ref[...],
                    preferred_element_type=jnp.float32) + be1_ref[...])   # (TB, 72)
    h = act(jnp.dot(h, we2_ref[...],
                    preferred_element_type=jnp.float32) + be2_ref[...])   # (TB, 64)

    # ---- action head layer 1: single matmul over packed [extero_feat | proprio] ----
    prop = xb[:, extero_dim:]                                      # (TB, P) bf16
    c = jnp.concatenate([h, prop], axis=-1)                        # (TB, 64+P)
    a = act(jnp.dot(c, wa1_ref[...],
                    preferred_element_type=jnp.float32) + ba1_ref[...])   # (TB, 256)

    # ---- action head layers 2 and 3 ----
    a = act(jnp.dot(a, wa2_ref[...],
                    preferred_element_type=jnp.float32) + ba2_ref[...])   # (TB, 160)
    a = act(jnp.dot(a, wa3_ref[...],
                    preferred_element_type=jnp.float32) + ba3_ref[...])   # (TB, 128)

    o_ref[...] = a.astype(o_ref.dtype)


# ------------------------------ Host wrapper ------------------------------ #
def actor_net_mlp_pallas(x, params, extero_dim, *, block_batch=2048,
                         out_dtype=jnp.bfloat16, tanh_dtype=jnp.bfloat16):
    """ActorNetMLP forward pass in a single batch-tiled Pallas kernel.

    x:          (B, extero_dim + proprio_dim) float32 — passed to the kernel as-is.
    params:     dict of weights (in, out) and biases (1, out), float32.
    out_dtype:  output dtype (default bf16; pass jnp.float32 for an f32 output).
    tanh_dtype: activation dtype (default bf16; pass jnp.float32 on v5e, which has
                no bf16 EUP/VPU).
    """
    (we1, be1), (we2, be2) = params["extero"]
    (wa1, ba1), (wa2, ba2), (wa3, ba3) = params["action"]

    b, in_dim = x.shape
    e = extero_dim
    p = in_dim - e
    h1 = we1.shape[1]
    h2 = we2.shape[1]           # extero feature dim fed to the action head
    a1 = ba1.shape[1]
    a2 = ba2.shape[1]
    out_dim = wa3.shape[1]
    assert wa1.shape[0] == h2 + p, "wa1 must take [extero_feature, proprio]"

    # ---- host-side prep: bf16 weight casts; fold the extero slice into we1 ----
    bf16 = jnp.bfloat16
    we1_b = jnp.zeros((in_dim, h1), bf16).at[:e, :].set(we1.astype(bf16))  # proprio rows = 0
    we2_b = we2.astype(bf16)
    wa1_b = wa1.astype(bf16)
    wa2_b = wa2.astype(bf16)
    wa3_b = wa3.astype(bf16)
    be1_f = be1.astype(jnp.float32)
    be2_f = be2.astype(jnp.float32)
    ba1_f = ba1.astype(jnp.float32)
    ba2_f = ba2.astype(jnp.float32)
    ba3_f = ba3.astype(jnp.float32)

    # ---- batch tiling: TB multiple of 8, no host padding (Pallas handles the
    #      partial last block); keep >= 2 blocks so v7x's two TCs both get work ----
    tb = max(8, min((block_batch // 8) * 8, _round_up(b, 8)))
    if b > 8:
        tb = min(tb, max(8, _round_up(pl.cdiv(b, 2), 8)))
    n_blocks = pl.cdiv(b, tb)

    weight_args = (we1_b, be1_f, we2_b, be2_f,
                   wa1_b, ba1_f, wa2_b, ba2_f, wa3_b, ba3_f)

    in_specs = [pl.BlockSpec((tb, in_dim), lambda i: (i, 0))] + [
        pl.BlockSpec(a.shape, lambda i: (0, 0)) for a in weight_args
    ]
    out_specs = pl.BlockSpec((tb, out_dim), lambda i: (i, 0))

    # ---- advisory cost estimate ----
    flops = 2 * b * (e * h1 + h1 * h2 + (h2 + p) * a1 + a1 * a2 + a2 * out_dim)
    transcendentals = b * (h1 + h2 + a1 + a2 + out_dim)
    out_itemsize = jnp.dtype(out_dtype).itemsize
    weight_bytes = sum(a.size * a.dtype.itemsize for a in weight_args)
    bytes_accessed = x.size * x.dtype.itemsize + weight_bytes + b * out_dim * out_itemsize

    # ---- explicit VMEM budget: double-buffered I/O tiles + resident weights +
    #      f32 intermediates, with headroom; clamped below v7x physical (64 MiB) ----
    vmem_est = (2 * tb * in_dim * 4
                + 2 * tb * out_dim * out_itemsize
                + 2 * weight_bytes
                + 2 * tb * (h1 + h2 + (h2 + p) + a1 + a2 + out_dim) * 4
                + (4 << 20))
    vmem_limit = int(min(max(32 << 20, vmem_est), 64 << 20))

    kernel = functools.partial(_actor_mlp_kernel, extero_dim=e, tanh_dtype=tanh_dtype)

    return pl.pallas_call(
        kernel,
        out_shape=jax.ShapeDtypeStruct((b, out_dim), out_dtype),
        grid=(n_blocks,),
        in_specs=in_specs,
        out_specs=out_specs,
        compiler_params=pltpu.CompilerParams(
            dimension_semantics=("parallel",),
            vmem_limit_bytes=vmem_limit,
        ),
        cost_estimate=pl.CostEstimate(
            flops=int(flops),
            transcendentals=int(transcendentals),
            bytes_accessed=int(bytes_accessed),
        ),
    )(x, *weight_args)


# --------------------------- Parameter creation ---------------------------- #
def init_params(key, extero_dim, proprio_dim,
                extero_layer_dims=(72, 64),
                action_layer_dims=(256, 160, 128)):
    """Deterministic synthetic init. Weights (in, out), biases (1, out)."""
    def linear(k, din, dout):
        kw, kb = jax.random.split(k)
        scale = 1.0 / jnp.sqrt(jnp.float32(din))
        w = jax.random.uniform(kw, (din, dout), jnp.float32, -scale, scale)
        bias = jax.random.uniform(kb, (1, dout), jnp.float32, -scale, scale)
        return w, bias

    keys = jax.random.split(key, len(extero_layer_dims) + len(action_layer_dims))
    ki = iter(keys)

    extero = []
    d = extero_dim
    for h in extero_layer_dims:
        extero.append(linear(next(ki), d, h))
        d = h
    extero_feature_dim = d

    action = []
    d = extero_feature_dim + proprio_dim  # locomotion branch is identity (default)
    for h in action_layer_dims:
        action.append(linear(next(ki), d, h))
        d = h

    return {"extero": extero, "action": action}


# ------------------------------- Reference -------------------------------- #
def actor_net_mlp_ref(x, params, extero_dim):
    ext, prop = x[:, :extero_dim], x[:, extero_dim:]
    h = ext
    for w, bias in params["extero"]:
        h = jnp.tanh(h @ w + bias)
    a = jnp.concatenate([h, prop], axis=-1)
    for w, bias in params["action"]:
        a = jnp.tanh(a @ w + bias)
    return a


# --------------------------------- Main ------------------------------------ #
if __name__ == "__main__":
    EXTERO_DIM = 48
    PROPRIO_DIM = 32
    BATCH = 128          # small demo batch; tiling logic gives grid=(2,) here

    key = jax.random.PRNGKey(0)
    k_x, k_p = jax.random.split(key)

    x = jax.random.normal(k_x, (BATCH, EXTERO_DIM + PROPRIO_DIM), jnp.float32)
    params = init_params(k_p, EXTERO_DIM, PROPRIO_DIM)

    out = actor_net_mlp_pallas(x, params, EXTERO_DIM)
    out = jax.block_until_ready(out)

    ref = actor_net_mlp_ref(x, params, EXTERO_DIM)
    assert out.shape == (BATCH, 128), out.shape
    err = float(jnp.max(jnp.abs(out.astype(jnp.float32) - ref)))
    # bf16 weights + bf16 activations + bf16 output vs. f32 reference
    assert err < 3e-2, err

    print("KERNEL_OK")
</pallas_src>

<mosaic_0001>
module attributes {stable_mosaic.version = 11 : i64} {
  func.func @_actor_mlp_kernel(%arg0: i32, %arg1: memref<64x80xf32, #tpu.memory_space<vmem>>, %arg2: memref<80x72xbf16, #tpu.memory_space<vmem>>, %arg3: memref<1x72xf32, #tpu.memory_space<vmem>>, %arg4: memref<72x64xbf16, #tpu.memory_space<vmem>>, %arg5: memref<1x64xf32, #tpu.memory_space<vmem>>, %arg6: memref<96x256xbf16, #tpu.memory_space<vmem>>, %arg7: memref<1x256xf32, #tpu.memory_space<vmem>>, %arg8: memref<256x160xbf16, #tpu.memory_space<vmem>>, %arg9: memref<1x160xf32, #tpu.memory_space<vmem>>, %arg10: memref<160x128xbf16, #tpu.memory_space<vmem>>, %arg11: memref<1x128xf32, #tpu.memory_space<vmem>>, %arg12: memref<64x128xbf16, #tpu.memory_space<vmem>>) attributes {dimension_semantics = [#tpu.dimension_semantics<parallel>], iteration_bounds = array<i64: 2>, scalar_prefetch = 0 : i64, scratch_operands = 0 : i64, tpu.core_type = #tpu.core_type<tc>, window_params = [{transform_indices = @transform_0, window_bounds = array<i64: 64, 80>}, {pipeline_mode = #tpu.pipeline_mode<synchronous>, transform_indices = @transform_1, window_bounds = array<i64: 80, 72>}, {pipeline_mode = #tpu.pipeline_mode<synchronous>, transform_indices = @transform_2, window_bounds = array<i64: 1, 72>}, {pipeline_mode = #tpu.pipeline_mode<synchronous>, transform_indices = @transform_3, window_bounds = array<i64: 72, 64>}, {pipeline_mode = #tpu.pipeline_mode<synchronous>, transform_indices = @transform_4, window_bounds = array<i64: 1, 64>}, {pipeline_mode = #tpu.pipeline_mode<synchronous>, transform_indices = @transform_5, window_bounds = array<i64: 96, 256>}, {pipeline_mode = #tpu.pipeline_mode<synchronous>, transform_indices = @transform_6, window_bounds = array<i64: 1, 256>}, {pipeline_mode = #tpu.pipeline_mode<synchronous>, transform_indices = @transform_7, window_bounds = array<i64: 256, 160>}, {pipeline_mode = #tpu.pipeline_mode<synchronous>, transform_indices = @transform_8, window_bounds = array<i64: 1, 160>}, {pipeline_mode = #tpu.pipeline_mode<synchronous>, transform_indices = @transform_9, window_bounds = array<i64: 160, 128>}, {pipeline_mode = #tpu.pipeline_mode<synchronous>, transform_indices = @transform_10, window_bounds = array<i64: 1, 128>}, {transform_indices = @transform_11, window_bounds = array<i64: 64, 128>}]} {
    %c0 = arith.constant 0 : index
    %c0_0 = arith.constant 0 : index
    %0 = vector.load %arg1[%c0, %c0_0] : memref<64x80xf32, #tpu.memory_space<vmem>>, vector<64x80xf32>
    %1 = arith.truncf %0 : vector<64x80xf32> to vector<64x80xbf16>
    %c0_1 = arith.constant 0 : index
    %c0_2 = arith.constant 0 : index
    %2 = vector.load %arg2[%c0_1, %c0_2] : memref<80x72xbf16, #tpu.memory_space<vmem>>, vector<80x72xbf16>
    %cst = arith.constant dense<0.000000e+00> : vector<64x72xf32>
    %3 = tpu.matmul %1, %2, %cst {dimension_numbers = #tpu.dot_dimension_numbers<[1], [0], [0], [1], [0, 0, 1, 1], [], []>} : vector<64x80xbf16>, vector<80x72xbf16>, vector<64x72xf32> -> vector<64x72xf32>
    %c0_3 = arith.constant 0 : index
    %c0_4 = arith.constant 0 : index
    %4 = vector.load %arg3[%c0_3, %c0_4] : memref<1x72xf32, #tpu.memory_space<vmem>>, vector<1x72xf32>
    %5 = vector.broadcast %4 : vector<1x72xf32> to vector<64x72xf32>
    %6 = arith.addf %3, %5 : vector<64x72xf32>
    %7 = arith.truncf %6 : vector<64x72xf32> to vector<64x72xbf16>
    %8 = math.tanh %7 : vector<64x72xbf16>
    %c0_5 = arith.constant 0 : index
    %c0_6 = arith.constant 0 : index
    %9 = vector.load %arg4[%c0_5, %c0_6] : memref<72x64xbf16, #tpu.memory_space<vmem>>, vector<72x64xbf16>
    %cst_7 = arith.constant dense<0.000000e+00> : vector<64x64xf32>
    %10 = tpu.matmul %8, %9, %cst_7 {dimension_numbers = #tpu.dot_dimension_numbers<[1], [0], [0], [1], [0, 0, 1, 1], [], []>} : vector<64x72xbf16>, vector<72x64xbf16>, vector<64x64xf32> -> vector<64x64xf32>
    %c0_8 = arith.constant 0 : index
    %c0_9 = arith.constant 0 : index
    %11 = vector.load %arg5[%c0_8, %c0_9] : memref<1x64xf32, #tpu.memory_space<vmem>>, vector<1x64xf32>
    %12 = vector.broadcast %11 : vector<1x64xf32> to vector<64x64xf32>
    %13 = arith.addf %10, %12 : vector<64x64xf32>
    %14 = arith.truncf %13 : vector<64x64xf32> to vector<64x64xbf16>
    %15 = math.tanh %14 : vector<64x64xbf16>
    %16 = vector.extract_strided_slice %1 {offsets = [0, 48], sizes = [64, 32], strides = [1, 1]} : vector<64x80xbf16> to vector<64x32xbf16>
    %17 = tpu.concatenate %15, %16 in 1 : vector<64x64xbf16>, vector<64x32xbf16> -> vector<64x96xbf16>
    %c0_10 = arith.constant 0 : index
    %c0_11 = arith.constant 0 : index
    %18 = vector.load %arg6[%c0_10, %c0_11] : memref<96x256xbf16, #tpu.memory_space<vmem>>, vector<96x256xbf16>
    %cst_12 = arith.constant dense<0.000000e+00> : vector<64x256xf32>
    %19 = tpu.matmul %17, %18, %cst_12 {dimension_numbers = #tpu.dot_dimension_numbers<[1], [0], [0], [1], [0, 0, 1, 1], [], []>} : vector<64x96xbf16>, vector<96x256xbf16>, vector<64x256xf32> -> vector<64x256xf32>
    %c0_13 = arith.constant 0 : index
    %c0_14 = arith.constant 0 : index
    %20 = vector.load %arg7[%c0_13, %c0_14] : memref<1x256xf32, #tpu.memory_space<vmem>>, vector<1x256xf32>
    %21 = vector.broadcast %20 : vector<1x256xf32> to vector<64x256xf32>
    %22 = arith.addf %19, %21 : vector<64x256xf32>
    %23 = arith.truncf %22 : vector<64x256xf32> to vector<64x256xbf16>
    %24 = math.tanh %23 : vector<64x256xbf16>
    %c0_15 = arith.constant 0 : index
    %c0_16 = arith.constant 0 : index
    %25 = vector.load %arg8[%c0_15, %c0_16] : memref<256x160xbf16, #tpu.memory_space<vmem>>, vector<256x160xbf16>
    %cst_17 = arith.constant dense<0.000000e+00> : vector<64x160xf32>
    %26 = tpu.matmul %24, %25, %cst_17 {dimension_numbers = #tpu.dot_dimension_numbers<[1], [0], [0], [1], [0, 0, 1, 1], [], []>} : vector<64x256xbf16>, vector<256x160xbf16>, vector<64x160xf32> -> vector<64x160xf32>
    %c0_18 = arith.constant 0 : index
    %c0_19 = arith.constant 0 : index
    %27 = vector.load %arg9[%c0_18, %c0_19] : memref<1x160xf32, #tpu.memory_space<vmem>>, vector<1x160xf32>
    %28 = vector.broadcast %27 : vector<1x160xf32> to vector<64x160xf32>
    %29 = arith.addf %26, %28 : vector<64x160xf32>
    %30 = arith.truncf %29 : vector<64x160xf32> to vector<64x160xbf16>
    %31 = math.tanh %30 : vector<64x160xbf16>
    %c0_20 = arith.constant 0 : index
    %c0_21 = arith.constant 0 : index
    %32 = vector.load %arg10[%c0_20, %c0_21] : memref<160x128xbf16, #tpu.memory_space<vmem>>, vector<160x128xbf16>
    %cst_22 = arith.constant dense<0.000000e+00> : vector<64x128xf32>
    %33 = tpu.matmul %31, %32, %cst_22 {dimension_numbers = #tpu.dot_dimension_numbers<[1], [0], [0], [1], [0, 0, 1, 1], [], []>} : vector<64x160xbf16>, vector<160x128xbf16>, vector<64x128xf32> -> vector<64x128xf32>
    %c0_23 = arith.constant 0 : index
    %c0_24 = arith.constant 0 : index
    %34 = vector.load %arg11[%c0_23, %c0_24] : memref<1x128xf32, #tpu.memory_space<vmem>>, vector<1x128xf32>
    %35 = vector.broadcast %34 : vector<1x128xf32> to vector<64x128xf32>
    %36 = arith.addf %33, %35 : vector<64x128xf32>
    %37 = arith.truncf %36 : vector<64x128xf32> to vector<64x128xbf16>
    %38 = math.tanh %37 : vector<64x128xbf16>
    %c0_25 = arith.constant 0 : index
    %c0_26 = arith.constant 0 : index
    %39 = vector.load %arg12[%c0_25, %c0_26] : memref<64x128xbf16, #tpu.memory_space<vmem>>, vector<64x128xbf16>
    tpu.vector_store %arg12[%c0_25, %c0_26], %38 {strides = array<i32>} : memref<64x128xbf16, #tpu.memory_space<vmem>>, vector<64x128xbf16>,
    return
  }
  func.func @transform_0(%arg0: i32) -> (i32, i32) {
    %c0_i32 = arith.constant 0 : i32
    %c0_i32_0 = arith.constant 0 : i32
    return %arg0, %c0_i32 : i32, i32
  }
  func.func @transform_1(%arg0: i32) -> (i32, i32) {
    %c0_i32 = arith.constant 0 : i32
    %c0_i32_0 = arith.constant 0 : i32
    %c0_i32_1 = arith.constant 0 : i32
    return %c0_i32, %c0_i32_0 : i32, i32
  }
  func.func @transform_2(%arg0: i32) -> (i32, i32) {
    %c0_i32 = arith.constant 0 : i32
    %c0_i32_0 = arith.constant 0 : i32
    %c0_i32_1 = arith.constant 0 : i32
    return %c0_i32, %c0_i32_0 : i32, i32
  }
  func.func @transform_3(%arg0: i32) -> (i32, i32) {
    %c0_i32 = arith.constant 0 : i32
    %c0_i32_0 = arith.constant 0 : i32
    %c0_i32_1 = arith.constant 0 : i32
    return %c0_i32, %c0_i32_0 : i32, i32
  }
  func.func @transform_4(%arg0: i32) -> (i32, i32) {
    %c0_i32 = arith.constant 0 : i32
    %c0_i32_0 = arith.constant 0 : i32
    %c0_i32_1 = arith.constant 0 : i32
    return %c0_i32, %c0_i32_0 : i32, i32
  }
  func.func @transform_5(%arg0: i32) -> (i32, i32) {
    %c0_i32 = arith.constant 0 : i32
    %c0_i32_0 = arith.constant 0 : i32
    %c0_i32_1 = arith.constant 0 : i32
    return %c0_i32, %c0_i32_0 : i32, i32
  }
  func.func @transform_6(%arg0: i32) -> (i32, i32) {
    %c0_i32 = arith.constant 0 : i32
    %c0_i32_0 = arith.constant 0 : i32
    %c0_i32_1 = arith.constant 0 : i32
    return %c0_i32, %c0_i32_0 : i32, i32
  }
  func.func @transform_7(%arg0: i32) -> (i32, i32) {
    %c0_i32 = arith.constant 0 : i32
    %c0_i32_0 = arith.constant 0 : i32
    %c0_i32_1 = arith.constant 0 : i32
    return %c0_i32, %c0_i32_0 : i32, i32
  }
  func.func @transform_8(%arg0: i32) -> (i32, i32) {
    %c0_i32 = arith.constant 0 : i32
    %c0_i32_0 = arith.constant 0 : i32
    %c0_i32_1 = arith.constant 0 : i32
    return %c0_i32, %c0_i32_0 : i32, i32
  }
  func.func @transform_9(%arg0: i32) -> (i32, i32) {
    %c0_i32 = arith.constant 0 : i32
    %c0_i32_0 = arith.constant 0 : i32
    %c0_i32_1 = arith.constant 0 : i32
    return %c0_i32, %c0_i32_0 : i32, i32
  }
  func.func @transform_10(%arg0: i32) -> (i32, i32) {
    %c0_i32 = arith.constant 0 : i32
    %c0_i32_0 = arith.constant 0 : i32
    %c0_i32_1 = arith.constant 0 : i32
    return %c0_i32, %c0_i32_0 : i32, i32
  }
  func.func @transform_11(%arg0: i32) -> (i32, i32) {
    %c0_i32 = arith.constant 0 : i32
    %c0_i32_0 = arith.constant 0 : i32
    return %arg0, %c0_i32 : i32, i32
  }
}

</mosaic_0001>

<bundles_post_ra>
// kernel: tpu_custom_call.1
= control target key start
LH: loop header
LB: loop body
LE: loop exit
PB: predicated region body
PF: predicated region fallthrough
CT: control target
= control target key end

     0   :  { %16 = vsyncpa [#allocation3], 0  ;;  %s2291_s0 = inlined_call_operand.vmem [shape: f32[128,80], index: 0, kind: input, shape index: {}]   ;;  %s2292_s1 = inlined_call_operand.vmem [shape: bf16[80,72], index: 1, kind: input, shape index: {}]   ;;  %s2293_s2 = inlined_call_operand.vmem [shape: f32[1,72], index: 2, kind: input, shape index: {}]   ;;  %s2294_s3 = inlined_call_operand.vmem [shape: bf16[72,64], index: 3, kind: input, shape index: {}]   ;;  %s2295_s4 = inlined_call_operand.vmem [shape: f32[1,64], index: 4, kind: input, shape index: {}]   ;;  %s2296_s5 = inlined_call_operand.vmem [shape: bf16[96,256], index: 5, kind: input, shape index: {}]   ;;  %s2297_s6 = inlined_call_operand.vmem [shape: f32[1,256], index: 6, kind: input, shape index: {}]   ;;  %s2298_s7 = inlined_call_operand.vmem [shape: bf16[256,160], index: 7, kind: input, shape index: {}]   ;;  %s2299_s8 = inlined_call_operand.vmem [shape: f32[1,160], index: 8, kind: input, shape index: {}]   ;;  %s2300_s9 = inlined_call_operand.vmem [shape: bf16[160,128], index: 9, kind: input, shape index: {}]   ;;  %s2301_s10 = inlined_call_operand.vmem [shape: f32[1,128], index: 10, kind: input, shape index: {}]   ;;  %s2302_s11 = inlined_call_operand.hbm [shape: bf16[128,128], index: 11, kind: output, shape index: {}]  }
   0x1   :  { %18 = vsyncpa [#allocation3 + $0x1], 0  ;;  %s1925_s17 = smov 0   ;;  %s1927_s18 = smov 0  }
   0x2   :  { %s1929_s19 = smov 0   ;;  %s1931_s20 = smov 0  }
   0x3 LB: > { %s1946_s21 = sadd.s32 4294967295, %s1858_s20   ;;  %s1452_s22 = sadd.s32 4294967294, %s1858_s20   ;;  %s1858_s20 = sphi %s1931_s20, %s2310_s20   ;;  %s1854_s19 = sphi %s1929_s19, %s2309_s19   ;;  %s1850_s18 = sphi %s1927_s18, %s2308_s18   ;;  %s1846_s17 = sphi %s1925_s17, %s2307_s17  }
   0x4   : > { %s1950_s23 = sadd.s32 1, %s1858_s20   ;;  %s267_s24 = sadd.s32 1, %s1854_s19 }
   0x5   : > { %s264_s25 = ssub.s32 %s1858_s20, %s1950_s23  ;;  %p277_p0 = scmp.ne.s32.totalorder %s1854_s19, %s1850_s18 }
   0x6   : > { %p265_p1 = scmp.eq.s32.totalorder %s264_s25, 0  ;;  %p278_p2 = scmp.eq.s32.totalorder %s1946_s21, 1 }
   0x7   : > { %p283_p3 = scmp.ne.s32.totalorder %s1850_s18, %s1846_s17  ;;  %p284_p4 = scmp.eq.s32.totalorder %s1452_s22, 1 }
   0x8   : > { %s1961_s26 = scalar_select %p265_p1, %s1854_s19, %s267_s24  }
   0x9   : > { %p1963_p5 = por %p278_p2, %p277_p0  ;;  %p1967_p6 = por %p284_p4, %p283_p3 }
   0xa   : > { %2303 = sst [smem:[#allocation5_spill]] %s1961_s26  ;;  %p1455_p7 = scmp.ge.s32.totalorder %s1858_s20, 1 }
   0xb   : > { %p341_p8 = scmp.lt.s32.totalorder %s1858_s20, 3 }
   0xd   : > { %p342_p9 = pnand %p1455_p7, %p341_p8 }
   0xe   : > { %v1654_v0 = vld [vmem:[%s2292_s1] sm:$0xff] (!%p342_p9)   ;;  %s1457_s12 = sshll.u32 (!%p342_p9), %s1946_s21, 3  ;;  %v1655_v1 = vld [vmem:[%s2292_s1 + $0x8] sm:$0xff] (!%p342_p9)   ;;  %v1656_v2 = vld [vmem:[%s2292_s1 + $0x10] sm:$0xff] (!%p342_p9)   ;;  %vm448_vm0 = vcmask (!%p342_p9), 654336   ;;  %vm590_vm1 = vcmask (!%p342_p9), 1043456  }
   0xf   : > { %345 = sbr.rel (%p342_p9) target bundleno = 1234 (0x4d2), region = 64  ;;  %p382_p10 = scmp.lt.s32.totalorder (!%p342_p9), %s1457_s12, 15  ;;  %1574 = vmatprep.subr.bf16.mxu0 (!%p342_p9), %v1654_v0  ;;  %v1657_v5 = vld [vmem:[%s2292_s1 + $0x18] sm:$0xff] (!%p342_p9)   ;;  %v1658_v7 = vld [vmem:[%s2292_s1 + $0x20] sm:$0xff] (!%p342_p9)   ;;  %v1660_v18 = vld [vmem:[%s2294_s3 + $0x8] sm:$0xff] (!%p342_p9)   ;;  %vm577_vm2 = vcmask (!%p342_p9), 588800  }
  0x10   : > { %1575 = vmatpush3.bf16.msra.mxu0 (!%p342_p9), %v1654_v0  ;;  %v1659_v17 = vld [vmem:[%s2294_s3] sm:$0xff] (!%p342_p9)   ;;  %v1661_v19 = vld [vmem:[%s2294_s3 + $0x10] sm:$0xff] (!%p342_p9)   ;;  %v1662_v20 = vld [vmem:[%s2294_s3 + $0x18] sm:$0xff] (!%p342_p9)   ;;  %s1860_s16 = smov (!%p342_p9), 16   ;;  %v1861_v60 = vmov (!%p342_p9), 0   ;;  %vm679_vm3 = vcmask (!%p342_p9), 523264  }
  0x11   : > { %1576 = vmatprep.subr.bf16.mxu0 (!%p342_p9), %v1655_v1  ;;  %1592 = vmatprep.subr.bf16.mxu1 (!%p342_p9), %v1659_v17  ;;  %v1663_v21 = vld [vmem:[%s2294_s3 + $0x20] ss:$0 sps:$4 sm:$0xff] (!%p342_p9)   ;;  %v1666_v24 = vld [vmem:[%s2296_s5 + $0x4] ss:$8 sps:$4 sm:$0xff] (!%p342_p9)   ;;  %v1669_v50 = vld [vmem:[%s2296_s5 + $0x14] ss:$8 sps:$4 sm:$0xff] (!%p342_p9)  }
  0x12   : > { %1593 = vmatpush3.bf16.msra.mxu1 (!%p342_p9), %v1659_v17  ;;  %v592_v22 = vsel (!%p342_p9), %vm590_vm1, %v1663_v21, 0  ;;  %v1664_v23 = vld [vmem:[%s2296_s5] ss:$8 sps:$4 sm:$0xff] (!%p342_p9)   ;;  %v1667_v51 = vld [vmem:[%s2296_s5 + $0x10] ss:$8 sps:$4 sm:$0xff] (!%p342_p9)   ;;  %vm776_vm4 = vcmask (!%p342_p9), 785408  }
  0x13   : > { %1594 = vmatprep.subr.bf16.mxu1 (!%p342_p9), %v1660_v18  ;;  %v1459_v26 = vld [vmem:[%s2293_s2] ss:$0 sm:$0xff] (!%p342_p9)  ;;  %v1672_v52 = vld [vmem:[%s2296_s5 + $0x24] ss:$8 sps:$4 sm:$0xff] (!%p342_p9)   ;;  %v1675_v54 = vld [vmem:[%s2296_s5 + $0x34] ss:$8 sps:$4 sm:$0xff] (!%p342_p9)  }
  0x14   : > { %1577 = vmatpush3.bf16.msra.mxu0 (!%p342_p9), %v1655_v1  ;;  %v1670_v53 = vld [vmem:[%s2296_s5 + $0x20] ss:$8 sps:$4 sm:$0xff] (!%p342_p9)   ;;  %v1673_v55 = vld [vmem:[%s2296_s5 + $0x30] ss:$8 sps:$4 sm:$0xff] (!%p342_p9)   ;;  %v1678_v56 = vld [vmem:[%s2296_s5 + $0x44] ss:$8 sps:$4 sm:$0xff] (!%p342_p9)  }
  0x15   : > { %1578 = vmatprep.subr.bf16.mxu0 (!%p342_p9), %v1656_v2  ;;  %v1676_v57 = vld [vmem:[%s2296_s5 + $0x40] ss:$8 sps:$4 sm:$0xff] (!%p342_p9)   ;;  %v1681_v58 = vld [vmem:[%s2296_s5 + $0x54] ss:$8 sps:$4 sm:$0xff] (!%p342_p9)   ;;  %v1679_v59 = vld [vmem:[%s2296_s5 + $0x50] ss:$8 sps:$4 sm:$0xff] (!%p342_p9)  }
  0x16   : > { %s2312_s12 = smov (!%p382_p10, %s1457_s12), 15  ;;  %1595 = vmatpush3.bf16.msra.mxu1 %v1660_v18  ;;  %v1682_v61 = vld [vmem:[%s2298_s7] ss:$8 sps:$4 sm:$0xff]   ;;  %v1684_v62 = vld [vmem:[%s2298_s7 + $0x4] ss:$8 sps:$4 sm:$0xff]   ;;  %vm1254_vm5 = vcmask 261120  }
  0x17   : > { %s1458_s22 = sshll.u32 %s2312_s12, 3  ;;  %1596 = vmatprep.subr.bf16.mxu1 %v1661_v19  ;;  %v1687_v63 = vld [vmem:[%s2298_s7 + $0x14] ss:$8 sps:$4 sm:$0xff]   ;;  %v1685_v0 = vld [vmem:[%s2298_s7 + $0x10] ss:$8 sps:$4 sm:$0xff]   ;;  %s378_s30 = sand.u32 1, %s1850_s18  }
  0x18   : > { %s385_s29 = scalar_lea.vmem %s2291_s0, %s1458_s22  ;;  %1579 = vmatpush3.bf16.msra.mxu0 %v1656_v2  ;;  %v1690_v1 = vld [vmem:[%s2298_s7 + $0x24] ss:$8 sps:$4 sm:$0xff]   ;;  %v1688_v2 = vld [vmem:[%s2298_s7 + $0x20] ss:$8 sps:$4 sm:$0xff]   ;;  %s1456_s13 = sshll.u32 %s378_s30, 5 }
  0x19   : > { %v389_v3 = vld [vmem:[%s385_s29] sm:$0xff]  ;;  %v390_v4 = vld [vmem:[%s385_s29 + $0x8] sm:$0xff]  ;;  %1580 = vmatprep.subr.bf16.mxu0 %v1657_v5  ;;  %v391_v8 = vld [vmem:[%s385_s29 + $0x10] sm:$0xff]  ;;  %s2229_s14 = scalar_lea.vmem [#allocation2], %s1456_s13  ;;  %s1555_s26 = sshll.u32 %s1946_s21, 9 }
  0x1a   : > { %v397_v6 = vpack.c.bf16 %v390_v4, %v389_v3  ;;  %v392_v9 = vld [vmem:[%s385_s29 + $0x18] sm:$0xff]  ;;  %v393_v10 = vld [vmem:[%s385_s29 + $0x20] sm:$0xff]  ;;  %v394_v11 = vld [vmem:[%s385_s29 + $0x28] sm:$0xff]  ;;  %1597 = vmatpush3.bf16.msra.mxu1 %v1661_v19  ;;  %s1390_s12 = sshll.u32 %s2229_s14, 4  ;;  %s2242_s22 = scalar_lea.hbm %s2302_s11, %s1555_s26  ;;  %s2244_s12 = int_to_ptr.vmem [resolvable:$true] %s1390_s12 }
  0x1b   : > { %v398_v12 = vpack.c.bf16 %v392_v9, %v391_v8  ;;  %v399_v13 = vpack.c.bf16 %v394_v11, %v393_v10  ;;  %v395_v14 = vld [vmem:[%s385_s29 + $0x30] sm:$0xff]  ;;  %v396_v15 = vld [vmem:[%s385_s29 + $0x38] sm:$0xff]  ;;  %1598 = vmatprep.subr.bf16.mxu1 %v1662_v20  ;;  %v1702_v9 = vld [vmem:[%s2298_s7 + $0x64] ss:$8 sps:$4 sm:$0xff]   ;;  %s2250_s24 = scalar_lea.sflag [#allocation3], %s378_s30  ;;  %s1796_s21 = scalar_lea.vmem %s2244_s12, 512 }
  0x1c   : > { %1584 = vmatprep.mubr.msk.bf16.mxu0 %vm448_vm0, %v397_v6  ;;  %1581 = vmatpush3.bf16.msra.mxu0 %v1657_v5  ;;  %v400_v16 = vpack.c.bf16 %v396_v15, %v395_v14  ;;  %v1693_v3 = vld [vmem:[%s2298_s7 + $0x34] ss:$8 sps:$4 sm:$0xff]   ;;  %v1691_v4 = vld [vmem:[%s2298_s7 + $0x30] ss:$8 sps:$4 sm:$0xff]   ;;  %v1696_v5 = vld [vmem:[%s2298_s7 + $0x44] ss:$8 sps:$4 sm:$0xff]   ;;  %p1797_p11 = scmp.ne.s32.totalorder %s2244_s12, %s1796_s21 }
  0x1d   : > { %1582 = vmatprep.subr.bf16.mxu0 %v1658_v7  ;;  %671 = vrot.lane.b32.xlu0 %v397_v6, %s1860_s16  ;;  %v1694_v6 = vld [vmem:[%s2298_s7 + $0x40] ss:$8 sps:$4 sm:$0xff]   ;;  %v1697_v8 = vld [vmem:[%s2298_s7 + $0x50] ss:$8 sps:$4 sm:$0xff]   ;;  %v1705_v11 = vld [vmem:[%s2298_s7 + $0x74] ss:$8 sps:$4 sm:$0xff]  }
  0x1e   : > { %1599 = vmatpush3.bf16.msra.mxu1 %v1662_v20  ;;  %675 = vrot.lane.b32.xlu1 %v399_v13, %s1860_s16  ;;  %v1700_v10 = vld [vmem:[%s2298_s7 + $0x60] ss:$8 sps:$4 sm:$0xff]   ;;  %v1711_v15 = vld [vmem:[%s2298_s7 + $0x94] ss:$8 sps:$4 sm:$0xff]   ;;  %v1714_v17 = vld [vmem:[%s2298_s7 + $0xa4] ss:$8 sps:$4 sm:$0xff]   ;;  %p1798_p12 = pnand %p1797_p11, %p1963_p5 }
  0x1f   : > { %1610 = vmatprep.subr.msk.bf16.mxu1 %vm590_vm1, %v1663_v21  ;;  %v1706_v14 = vld [vmem:[%s2298_s7 + $0x80] ss:$8 sps:$4 sm:$0xff]   ;;  %s1862_s25 = smov [#allocation2]  }
  0x20   : > { %1583 = vmatpush3.bf16.msra.mxu0 %v1658_v7  ;;  %v1699_v7 = vld [vmem:[%s2298_s7 + $0x54] ss:$8 sps:$4 sm:$0xff]   ;;  %v1712_v18 = vld [vmem:[%s2298_s7 + $0xa0] ss:$8 sps:$4 sm:$0xff]   ;;  %p1799_p13 = pneg %p1798_p12  ;;  %s1800_s29 = sshll.u32 %s1862_s25, 4  ;;  %s1801_s29 = int_to_ptr.vmem [resolvable:$false] %s1800_s29 }
  0x21   : > { %785 = vmatprep.subr.bf16.mxu0 %v1666_v24  ;;  %673 = vrot.lane.b32.xlu0 %v398_v12, %s1860_s16  ;;  %v1469_v20 = vld [vmem:[%s2295_s4] ss:$0 sm:$0xff]  ;;  %s1802_s13 = scalar_lea.vmem %s1801_s29, 1024  ;;  %p1803_p0 = scmp.lt.s32.totalorder %s2244_s12, %s1801_s29 }
  0x22   : > { %1601 = vmatpush3.bf16.msra.mxu1 %v592_v22  ;;  %677 = vrot.lane.b32.xlu1 %v400_v16, %s1860_s16  ;;  %p1804_p1 = scmp.lt.s32.totalorder %s1802_s13, %s1796_s21 }
  0x23   : > { %1585 = vmatmul.mubr.msk.bf16.vlgmr.msra.gmra.mrb[0].mxu0 %vm448_vm0, %v398_v12  ;;  %1078 = vmatprep.subr.bf16.mxu1 %v1684_v62  ;;  %v1703_v12 = vld [vmem:[%s2298_s7 + $0x70] ss:$8 sps:$4 sm:$0xff]  }
  0x24   : > { %1588 = vmatprep.mubr.msk.bf16.mxu0 %vm448_vm0, %v399_v13  ;;  %786 = vmatpush1.bf16.msra.mxu0 %v1664_v23  ;;  %v1708_v13 = vld [vmem:[%s2298_s7 + $0x84] ss:$8 sps:$4 sm:$0xff]   ;;  %v1727_v62 = vld [vmem:[%s2298_s7 + $0xf0] ss:$8 sps:$4 sm:$0xff]   ;;  %p1805_p2 = por %p1804_p1, %p1803_p0 }
  0x25   : > { %787 = vmatprep.subr.bf16.mxu0 %v1669_v50 }
  0x26   : > { %p1806_p3 = pnand %p1805_p2, %p1799_p13 }
  0x28   : > { %788 = vmatpush1.bf16.msra.mxu0 %v1667_v51 }
  0x29   : > { %789 = vmatprep.subr.bf16.mxu0 %v1672_v52  ;;  %v1717_v52 = vld [vmem:[%s2298_s7 + $0xb4] ss:$8 sps:$4 sm:$0xff]  }
  0x2b   : > { %1589 = vmatmul.mubr.msk.bf16.gmra.mrb[4].mxu0 %vm448_vm0, %v400_v16  ;;  %v1709_v16 = vld [vmem:[%s2298_s7 + $0x90] ss:$8 sps:$4 sm:$0xff]  }
  0x2c   : > { %790 = vmatpush1.bf16.msra.mxu0 %v1670_v53  ;;  %817 = vmatprep.mubr.bf16.mxu0 %v1861_v60  ;;  %v1715_v53 = vld [vmem:[%s2298_s7 + $0xb0] ss:$8 sps:$4 sm:$0xff]  }
  0x2d   : > { %791 = vmatprep.subr.bf16.mxu0 %v1675_v54  ;;  %v1720_v54 = vld [vmem:[%s2298_s7 + $0xc4] ss:$8 sps:$4 sm:$0xff]  }
  0x30   : > { %792 = vmatpush1.bf16.msra.mxu0 %v1673_v55  ;;  %v1718_v55 = vld [vmem:[%s2298_s7 + $0xc0] ss:$8 sps:$4 sm:$0xff]  }
  0x31   : > { %793 = vmatprep.subr.bf16.mxu0 %v1678_v56  ;;  %v1723_v56 = vld [vmem:[%s2298_s7 + $0xd4] ss:$8 sps:$4 sm:$0xff]  }
  0x34   : > { %794 = vmatpush1.bf16.msra.mxu0 %v1676_v57  ;;  %v1721_v57 = vld [vmem:[%s2298_s7 + $0xd0] ss:$8 sps:$4 sm:$0xff]  }
  0x35   : > { %795 = vmatprep.subr.bf16.mxu0 %v1681_v58  ;;  %v1726_v58 = vld [vmem:[%s2298_s7 + $0xe4] ss:$8 sps:$4 sm:$0xff]  }
  0x38   : > { %796 = vmatpush1.bf16.msra.mxu0 %v1679_v59  ;;  %v1724_v59 = vld [vmem:[%s2298_s7 + $0xe0] ss:$8 sps:$4 sm:$0xff]  }
  0x39   : > { %1267 = vmatprep.subr.bf16.mxu0 %v1861_v60 }
  0xf6   : > { %v1586_v25 = vpop.f32.mrb[0].mxu0 }
  0xf7   : > { %v495_v27 = vpop.f32.mrb[1].mxu0  ;;  %v504_v29 = vadd.f32 %v1586_v25, %v1459_v26 }
  0xf8   : > { %v1587_v28 = vpop.f32.mrb[2].mxu0  ;;  %v496_v32 = vadd.f32 %v1459_v26, %v495_v27 }
  0xf9   : > { %v507_v30 = vadd.f32 %v1587_v28, %v1459_v26  ;;  %v498_v31 = vpop.f32.mrb[3].mxu0 }
  0xfa   : > { %v499_v33 = vadd.f32 %v1459_v26, %v498_v31 }
  0xfb   : > { %v527_v34 = vpack.c.bf16 %v507_v30, %v504_v29 }
  0xfc   : > { %v526_v35 = vpack.c.bf16 %v499_v33, %v496_v32 }
  0xfe   : > { %1740 = vtanh.bf16 %v526_v35  ;;  %v1590_v36 = vpop.f32.mrb[4].mxu0 }
  0xff   : > { %1742 = vtanh.bf16 %v527_v34  ;;  %v520_v37 = vadd.f32 %v1590_v36, %v1459_v26  ;;  %v511_v38 = vpop.f32.mrb[5].mxu0 }
 0x100   : > { %v512_v39 = vadd.f32 %v1459_v26, %v511_v38  ;;  %v1591_v40 = vpop.f32.mrb[6].mxu0 }
 0x101   : > { %v523_v41 = vadd.f32 %v1591_v40, %v1459_v26  ;;  %v514_v42 = vpop.f32.mrb[7].mxu0 }
 0x102   : > { %v515_v43 = vadd.f32 %v1459_v26, %v514_v42 }
 0x103   : > { %v529_v44 = vpack.c.bf16 %v523_v41, %v520_v37  ;;  %v672_v41 = vpop.permute.xlu0 %671 }
 0x104   : > { %v528_v45 = vpack.c.bf16 %v515_v43, %v512_v39 }
 0x105   : > { %1744 = vtanh.bf16 %v529_v44 }
 0x106   : > { %1746 = vtanh.bf16 %v528_v45 }
 0x107   : > { %v674_v44 = vpop.permute.xlu0 %673 }
 0x109   : > { %v1741_v46 = vpop.eup %1740 }
 0x10a   : > { %v1743_v47 = vpop.eup %1742  ;;  %1602 = vmatprep.mubr.msk.bf16.mxu1 %vm577_vm2, %v1741_v46 }
 0x10b   : > { %1603 = vmatmul.mubr.msk.bf16.vlgmr.msra.gmra.mrb[0].mxu1 %vm577_vm2, %v1743_v47  ;;  %v676_v47 = vpop.permute.xlu1 %675 }
 0x10c   : > { %1079 = vmatpush1.bf16.msra.mxu1 %v1682_v61  ;;  %v1729_v61 = vld [vmem:[%s2298_s7 + $0xf4] ss:$8 sps:$4 sm:$0xff]  }
 0x10d   : > { %1080 = vmatprep.subr.bf16.mxu1 %v1687_v63  ;;  %v1730_v63 = vld [vmem:[%s2300_s9] sm:$0xff]  }
 0x10f   : > { %v678_v50 = vpop.permute.xlu1 %677 }
 0x110   : > { %v1745_v48 = vpop.eup %1744  ;;  %1081 = vmatpush1.bf16.msra.mxu1 %v1685_v0  ;;  %v1731_v0 = vld [vmem:[%s2300_s9 + $0x8] sm:$0xff]  }
 0x111   : > { %v1747_v49 = vpop.eup %1746  ;;  %1082 = vmatprep.subr.bf16.mxu1 %v1690_v1  ;;  %v1732_v1 = vld [vmem:[%s2300_s9 + $0x10] sm:$0xff]  }
 0x112   : > { %1606 = vmatprep.mubr.msk.bf16.mxu1 %vm577_vm2, %v1747_v49 }
 0x113   : > { %1607 = vmatmul.mubr.msk.bf16.gmra.mrb[4].mxu1 %vm577_vm2, %v1745_v48 }
 0x114   : > { %1083 = vmatpush1.bf16.msra.mxu1 %v1688_v2  ;;  %v1733_v2 = vld [vmem:[%s2300_s9 + $0x18] sm:$0xff]  }
 0x115   : > { %1084 = vmatprep.subr.bf16.mxu1 %v1693_v3  ;;  %v1734_v3 = vld [vmem:[%s2300_s9 + $0x20] sm:$0xff]  }
 0x118   : > { %1085 = vmatpush1.bf16.msra.mxu1 %v1691_v4  ;;  %v706_v4 = vlaneseq }
 0x119   : > { %1086 = vmatprep.subr.bf16.mxu1 %v1696_v5 }
 0x11a   : > { %v2182_v5 = vshrl.u32 %v706_v4, 7 }
 0x11c   : > { %1087 = vmatpush1.bf16.msra.mxu1 %v1694_v6  ;;  %v708_v6 = vsub.s32 0, %v2182_v5 }
 0x11d   : > { %1088 = vmatprep.subr.bf16.mxu1 %v1699_v7  ;;  %v704_v7 = vld [vmem:[%s2297_s6] sm:$0x3] }
 0x120   : > { %1089 = vmatpush1.bf16.msra.mxu1 %v1697_v8  ;;  %v712_v8 = vsub.s32 1, %v2182_v5 }
 0x121   : > { %1090 = vmatprep.subr.bf16.mxu1 %v1702_v9  ;;  %v709_v9 = vrot.slane %v704_v7, %v708_v6 }
 0x124   : > { %1091 = vmatpush1.bf16.msra.mxu1 %v1700_v10 }
 0x125   : > { %1092 = vmatprep.subr.bf16.mxu1 %v1705_v11  ;;  %v713_v11 = vrot.slane %v704_v7, %v712_v8 }
 0x128   : > { %1093 = vmatpush1.bf16.msra.mxu1 %v1703_v12 }
 0x129   : > { %1094 = vmatprep.subr.bf16.mxu1 %v1708_v13 }
 0x12c   : > { %1095 = vmatpush1.bf16.msra.mxu1 %v1706_v14 }
 0x12d   : > { %1096 = vmatprep.subr.bf16.mxu1 %v1711_v15 }
 0x130   : > { %1097 = vmatpush1.bf16.msra.mxu1 %v1709_v16 }
 0x131   : > { %1098 = vmatprep.subr.bf16.mxu1 %v1714_v17 }
 0x134   : > { %1099 = vmatpush1.bf16.msra.mxu1 %v1712_v18 }
 0x135   : > { %1100 = vmatprep.subr.bf16.mxu1 %v1717_v52 }
 0x138   : > { %1101 = vmatpush1.bf16.msra.mxu1 %v1715_v53 }
 0x139   : > { %1102 = vmatprep.subr.bf16.mxu1 %v1720_v54 }
 0x13c   : > { %1103 = vmatpush1.bf16.msra.mxu1 %v1718_v55 }
 0x13d   : > { %1104 = vmatprep.subr.bf16.mxu1 %v1723_v56 }
 0x140   : > { %1105 = vmatpush1.bf16.msra.mxu1 %v1721_v57 }
 0x141   : > { %1106 = vmatprep.subr.bf16.mxu1 %v1726_v58 }
 0x144   : > { %1107 = vmatpush1.bf16.msra.mxu1 %v1724_v59  ;;  %v1735_v59 = vld [vmem:[%s2300_s9 + $0x28] sm:$0xff]  }
 0x145   : > { %1108 = vmatprep.subr.bf16.mxu1 %v1729_v61  ;;  %v1736_v61 = vld [vmem:[%s2300_s9 + $0x30] sm:$0xff]  }
 0x148   : > { %1109 = vmatpush1.bf16.msra.mxu1 %v1727_v62  ;;  %v1737_v62 = vld [vmem:[%s2300_s9 + $0x38] sm:$0xff]  }
 0x1de   : > { %v1604_v19 = vpop.f32.mrb[0].mxu1 }
 0x1df   : > { %v628_v21 = vpop.f32.mrb[1].mxu1  ;;  %v637_v23 = vadd.f32 %v1604_v19, %v1469_v20 }
 0x1e0   : > { %v1605_v22 = vpop.f32.mrb[2].mxu1  ;;  %v629_v26 = vadd.f32 %v1469_v20, %v628_v21 }
 0x1e1   : > { %v640_v24 = vadd.f32 %v1605_v22, %v1469_v20  ;;  %v631_v25 = vpop.f32.mrb[3].mxu1 }
 0x1e2   : > { %v632_v27 = vadd.f32 %v1469_v20, %v631_v25 }
 0x1e3   : > { %v660_v28 = vpack.c.bf16 %v640_v24, %v637_v23 }
 0x1e4   : > { %v659_v29 = vpack.c.bf16 %v632_v27, %v629_v26 }
 0x1e6   : > { %1748 = vtanh.bf16 %v659_v29  ;;  %v1608_v30 = vpop.f32.mrb[4].mxu1 }
 0x1e7   : > { %v653_v31 = vadd.f32 %v1608_v30, %v1469_v20  ;;  %v644_v32 = vpop.f32.mrb[5].mxu1  ;;  %1750 = vtanh.bf16 %v660_v28 }
 0x1e8   : > { %v645_v33 = vadd.f32 %v1469_v20, %v644_v32  ;;  %v1609_v34 = vpop.f32.mrb[6].mxu1 }
 0x1e9   : > { %v656_v35 = vadd.f32 %v1609_v34, %v1469_v20  ;;  %v647_v36 = vpop.f32.mrb[7].mxu1 }
 0x1ea   : > { %v648_v37 = vadd.f32 %v1469_v20, %v647_v36 }
 0x1eb   : > { %v662_v38 = vpack.c.bf16 %v656_v35, %v653_v31 }
 0x1ec   : > { %v661_v39 = vpack.c.bf16 %v648_v37, %v645_v33 }
 0x1ee   : > { %1752 = vtanh.bf16 %v661_v39 }
 0x1ef   : > { %1754 = vtanh.bf16 %v662_v38 }
 0x1f1   : > { %v1749_v40 = vpop.eup %1748 }
 0x1f2   : > { %v682_v42 = vsel %vm679_vm3, %v1749_v40, %v672_v41  ;;  %v1751_v43 = vpop.eup %1750 }
 0x1f3   : > { %1491 = vmatmul.mubr.msk.bf16.vlgmr.msra.gmra.mrb[8].mxu0 %vm776_vm4, %v682_v42  ;;  %v685_v45 = vsel %vm679_vm3, %v1751_v43, %v674_v44 }
 0x1f4   : > { %827 = vmatprep.mubr.bf16.mxu0 %v1861_v60  ;;  %1268 = vmatpush1.bf16.msra.mxu0 %v1730_v63  ;;  %v1738_v63 = vld [vmem:[%s2300_s9 + $0x40] sm:$0xff]  }
 0x1f5   : > { %1269 = vmatprep.subr.bf16.mxu0 %v1861_v60 }
 0x1f8   : > { %1270 = vmatpush1.bf16.msra.mxu0 %v1731_v0  ;;  %v1739_v0 = vld [vmem:[%s2300_s9 + $0x48] sm:$0xff]  }
 0x1f9   : > { %v1753_v46 = vpop.eup %1752  ;;  %1271 = vmatprep.subr.bf16.mxu0 %v1861_v60 }
 0x1fa   : > { %v688_v48 = vsel %vm679_vm3, %v1753_v46, %v676_v47  ;;  %v1755_v49 = vpop.eup %1754 }
 0x1fb   : > { %1492 = vmatmul.mubr.msk.bf16.gmra.mrb[12].mxu0 %vm776_vm4, %v685_v45  ;;  %v691_v51 = vsel %vm679_vm3, %v1755_v49, %v678_v50 }
 0x1fc   : > { %837 = vmatprep.mubr.bf16.mxu0 %v1861_v60  ;;  %1272 = vmatpush1.bf16.msra.mxu0 %v1732_v1  ;;  %v906_v1 = vld [vmem:[%s2299_s8] sm:$0x3] }
 0x1fd   : > { %1273 = vmatprep.subr.bf16.mxu0 %v1861_v60  ;;  %v915_v4 = vrot.slane %v906_v1, %v712_v8 }
 0x200   : > { %1274 = vmatpush1.bf16.msra.mxu0 %v1733_v2  ;;  %v911_v2 = vrot.slane %v906_v1, %v708_v6 }
 0x201   : > { %1275 = vmatprep.subr.bf16.mxu0 %v1861_v60 }
 0x203   : > { %1493 = vmatmul.mubr.msk.bf16.gmra.mrb[16].mxu0 %vm776_vm4, %v688_v48 }
 0x204   : > { %847 = vmatprep.mubr.bf16.mxu0 %v1861_v60  ;;  %1276 = vmatpush1.bf16.msra.mxu0 %v1734_v3 }
 0x205   : > { %1277 = vmatprep.subr.bf16.mxu0 %v1861_v60 }
 0x208   : > { %1278 = vmatpush1.bf16.msra.mxu0 %v1735_v59 }
 0x209   : > { %1279 = vmatprep.subr.bf16.mxu0 %v1861_v60 }
 0x20b   : > { %1494 = vmatmul.mubr.msk.bf16.gmra.mrb[20].mxu0 %vm776_vm4, %v691_v51 }
 0x20c   : > { %1280 = vmatpush1.bf16.msra.mxu0 %v1736_v61 }
 0x20d   : > { %1281 = vmatprep.subr.bf16.mxu0 %v1861_v60 }
 0x210   : > { %1282 = vmatpush1.bf16.msra.mxu0 %v1737_v62 }
 0x211   : > { %1283 = vmatprep.subr.bf16.mxu0 %v1861_v60 }
 0x214   : > { %1284 = vmatpush1.bf16.msra.mxu0 %v1738_v63 }
 0x215   : > { %1285 = vmatprep.subr.bf16.mxu0 %v1861_v60 }
 0x218   : > { %1286 = vmatpush1.bf16.msra.mxu0 %v1739_v0 }
 0x2c6   : > { %v819_v10 = vpop.f32.mrb[8].mxu0 }
 0x2c7   : > { %v821_v12 = vpop.f32.mrb[9].mxu0  ;;  %v820_v14 = vadd.f32 %v819_v10, %v709_v9 }
 0x2c8   : > { %v823_v13 = vpop.f32.mrb[10].mxu0  ;;  %v822_v17 = vadd.f32 %v821_v12, %v713_v11 }
 0x2c9   : > { %v824_v15 = vadd.f32 %v823_v13, %v709_v9  ;;  %v825_v16 = vpop.f32.mrb[11].mxu0 }
 0x2ca   : > { %v826_v18 = vadd.f32 %v825_v16, %v713_v11 }
 0x2cb   : > { %v858_v19 = vpack.c.bf16 %v824_v15, %v820_v14 }
 0x2cc   : > { %v859_v20 = vpack.c.bf16 %v826_v18, %v822_v17 }
 0x2ce   : > { %1756 = vtanh.bf16 %v859_v20  ;;  %v829_v21 = vpop.f32.mrb[12].mxu0 }
 0x2cf   : > { %1758 = vtanh.bf16 %v858_v19  ;;  %v831_v22 = vpop.f32.mrb[13].mxu0  ;;  %v830_v24 = vadd.f32 %v829_v21, %v709_v9 }
 0x2d0   : > { %v833_v23 = vpop.f32.mrb[14].mxu0  ;;  %v832_v27 = vadd.f32 %v831_v22, %v713_v11 }
 0x2d1   : > { %v834_v25 = vadd.f32 %v833_v23, %v709_v9  ;;  %v835_v26 = vpop.f32.mrb[15].mxu0 }
 0x2d2   : > { %v836_v28 = vadd.f32 %v835_v26, %v713_v11 }
 0x2d3   : > { %v860_v29 = vpack.c.bf16 %v834_v25, %v830_v24 }
 0x2d4   : > { %v861_v30 = vpack.c.bf16 %v836_v28, %v832_v27 }
 0x2d6   : > { %1760 = vtanh.bf16 %v861_v30  ;;  %v839_v31 = vpop.f32.mrb[16].mxu0 }
 0x2d7   : > { %1762 = vtanh.bf16 %v860_v29  ;;  %v841_v32 = vpop.f32.mrb[17].mxu0  ;;  %v840_v35 = vadd.f32 %v839_v31, %v709_v9 }
 0x2d8   : > { %v843_v33 = vpop.f32.mrb[18].mxu0  ;;  %v842_v39 = vadd.f32 %v841_v32, %v713_v11 }
 0x2d9   : > { %v1757_v34 = vpop.eup %1756  ;;  %v844_v36 = vadd.f32 %v843_v33, %v709_v9  ;;  %v845_v37 = vpop.f32.mrb[19].mxu0 }
 0x2da   : > { %v1759_v38 = vpop.eup %1758  ;;  %v846_v40 = vadd.f32 %v845_v37, %v713_v11  ;;  %1110 = vmatprep.mubr.bf16.mxu1 %v1757_v34 }
 0x2db   : > { %v862_v41 = vpack.c.bf16 %v844_v36, %v840_v35  ;;  %1111 = vmatmul.mubr.bf16.vlgmr.msra.gmra.mrb[8].mxu1 %v1759_v38 }
 0x2dc   : > { %v863_v42 = vpack.c.bf16 %v846_v40, %v842_v39 }
 0x2de   : > { %1764 = vtanh.bf16 %v863_v42  ;;  %v849_v43 = vpop.f32.mrb[20].mxu0 }
 0x2df   : > { %1766 = vtanh.bf16 %v862_v41  ;;  %v851_v44 = vpop.f32.mrb[21].mxu0  ;;  %v850_v47 = vadd.f32 %v849_v43, %v709_v9 }
 0x2e0   : > { %v853_v45 = vpop.f32.mrb[22].mxu0  ;;  %v852_v51 = vadd.f32 %v851_v44, %v713_v11 }
 0x2e1   : > { %v1761_v46 = vpop.eup %1760  ;;  %v854_v48 = vadd.f32 %v853_v45, %v709_v9  ;;  %v855_v49 = vpop.f32.mrb[23].mxu0 }
 0x2e2   : > { %v1763_v50 = vpop.eup %1762  ;;  %v856_v52 = vadd.f32 %v855_v49, %v713_v11  ;;  %1120 = vmatprep.mubr.bf16.mxu1 %v1761_v46 }
 0x2e3   : > { %v864_v53 = vpack.c.bf16 %v854_v48, %v850_v47  ;;  %1121 = vmatmul.mubr.bf16.gmra.mrb[12].mxu1 %v1763_v50 }
 0x2e4   : > { %v865_v54 = vpack.c.bf16 %v856_v52, %v852_v51  ;;  %v1527_v51 = vld [vmem:[%s2301_s10] ss:$0 sm:$0xff] }
 0x2e6   : > { %1768 = vtanh.bf16 %v865_v54 }
 0x2e7   : > { %1770 = vtanh.bf16 %v864_v53 }
 0x2e9   : > { %v1765_v55 = vpop.eup %1764 }
 0x2ea   : > { %v1767_v56 = vpop.eup %1766  ;;  %1130 = vmatprep.mubr.bf16.mxu1 %v1765_v55 }
 0x2eb   : > { %1131 = vmatmul.mubr.bf16.gmra.mrb[16].mxu1 %v1767_v56 }
 0x2f1   : > { %v1769_v57 = vpop.eup %1768 }
 0x2f2   : > { %v1771_v58 = vpop.eup %1770  ;;  %1140 = vmatprep.mubr.bf16.mxu1 %v1769_v57 }
 0x2f3   : > { %1141 = vmatmul.mubr.bf16.gmra.mrb[20].mxu1 %v1771_v58 }
 0x3ae   : > { %v1112_v3 = vpop.f32.mrb[8].mxu1 }
 0x3af   : > { %v1114_v7 = vpop.f32.mrb[9].mxu1  ;;  %v1113_v10 = vadd.f32 %v1112_v3, %v911_v2 }
 0x3b0   : > { %v1116_v9 = vpop.f32.mrb[10].mxu1  ;;  %v1115_v12 = vadd.f32 %v1114_v7, %v915_v4 }
 0x3b1   : > { %v1117_v60 = vadd.f32 %v1116_v9, %v911_v2  ;;  %v1118_v11 = vpop.f32.mrb[11].mxu1 }
 0x3b2   : > { %v1119_v13 = vadd.f32 %v1118_v11, %v915_v4 }
 0x3b3   : > { %v1151_v14 = vpack.c.bf16 %v1117_v60, %v1113_v10 }
 0x3b4   : > { %v1152_v15 = vpack.c.bf16 %v1119_v13, %v1115_v12 }
 0x3b6   : > { %1772 = vtanh.bf16 %v1152_v15  ;;  %v1122_v16 = vpop.f32.mrb[12].mxu1 }
 0x3b7   : > { %1774 = vtanh.bf16 %v1151_v14  ;;  %v1124_v17 = vpop.f32.mrb[13].mxu1  ;;  %v1123_v19 = vadd.f32 %v1122_v16, %v911_v2 }
 0x3b8   : > { %v1126_v18 = vpop.f32.mrb[14].mxu1  ;;  %v1125_v21 = vadd.f32 %v1124_v17, %v915_v4 }
 0x3b9   : > { %v1127_v6 = vadd.f32 %v1126_v18, %v911_v2  ;;  %v1128_v20 = vpop.f32.mrb[15].mxu1 }
 0x3ba   : > { %v1129_v5 = vadd.f32 %v1128_v20, %v915_v4 }
 0x3bb   : > { %v1153_v8 = vpack.c.bf16 %v1127_v6, %v1123_v19 }
 0x3bc   : > { %v1154_v22 = vpack.c.bf16 %v1129_v5, %v1125_v21 }
 0x3be   : > { %1776 = vtanh.bf16 %v1154_v22  ;;  %v1132_v23 = vpop.f32.mrb[16].mxu1 }
 0x3bf   : > { %1778 = vtanh.bf16 %v1153_v8  ;;  %v1134_v24 = vpop.f32.mrb[17].mxu1  ;;  %v1133_v27 = vadd.f32 %v1132_v23, %v911_v2 }
 0x3c0   : > { %v1136_v25 = vpop.f32.mrb[18].mxu1  ;;  %v1135_v31 = vadd.f32 %v1134_v24, %v915_v4 }
 0x3c1   : > { %v1773_v26 = vpop.eup %1772  ;;  %v1137_v28 = vadd.f32 %v1136_v25, %v911_v2  ;;  %v1138_v29 = vpop.f32.mrb[19].mxu1 }
 0x3c2   : > { %v1775_v30 = vpop.eup %1774  ;;  %v1139_v32 = vadd.f32 %v1138_v29, %v915_v4  ;;  %1538 = vmatprep.mubr.msk.bf16.mxu0 %vm1254_vm5, %v1773_v26 }
 0x3c3   : > { %v1155_v33 = vpack.c.bf16 %v1137_v28, %v1133_v27  ;;  %1300 = vmatmul.mubr.bf16.vlgmr.msra.gmra.mrb[24].mxu0 %v1775_v30 }
 0x3c4   : > { %v1156_v34 = vpack.c.bf16 %v1139_v32, %v1135_v31 }
 0x3c6   : > { %1780 = vtanh.bf16 %v1156_v34  ;;  %v1142_v35 = vpop.f32.mrb[20].mxu1 }
 0x3c7   : > { %1782 = vtanh.bf16 %v1155_v33  ;;  %v1144_v36 = vpop.f32.mrb[21].mxu1  ;;  %v1143_v39 = vadd.f32 %v1142_v35, %v911_v2 }
 0x3c8   : > { %v1146_v37 = vpop.f32.mrb[22].mxu1  ;;  %v1145_v43 = vadd.f32 %v1144_v36, %v915_v4 }
 0x3c9   : > { %v1777_v38 = vpop.eup %1776  ;;  %v1147_v40 = vadd.f32 %v1146_v37, %v911_v2  ;;  %v1148_v41 = vpop.f32.mrb[23].mxu1 }
 0x3ca   : > { %v1779_v42 = vpop.eup %1778  ;;  %v1149_v44 = vadd.f32 %v1148_v41, %v915_v4  ;;  %1539 = vmatprep.mubr.msk.bf16.mxu0 %vm1254_vm5, %v1777_v38 }
 0x3cb   : > { %v1157_v45 = vpack.c.bf16 %v1147_v40, %v1143_v39  ;;  %1308 = vmatmul.mubr.bf16.gmra.mrb[28].mxu0 %v1779_v42 }
 0x3cc   : > { %v1158_v46 = vpack.c.bf16 %v1149_v44, %v1145_v43 }
 0x3ce   : > { %1784 = vtanh.bf16 %v1158_v46 }
 0x3cf   : > { %1786 = vtanh.bf16 %v1157_v45 }
 0x3d1   : > { %v1781_v47 = vpop.eup %1780 }
 0x3d2   : > { %v1783_v48 = vpop.eup %1782  ;;  %1540 = vmatprep.mubr.msk.bf16.mxu0 %vm1254_vm5, %v1781_v47 }
 0x3d3   : > { %1316 = vmatmul.mubr.bf16.gmra.mrb[32].mxu0 %v1783_v48 }
 0x3d9   : > { %v1785_v49 = vpop.eup %1784 }
 0x3da   : > { %v1787_v50 = vpop.eup %1786  ;;  %1541 = vmatprep.mubr.msk.bf16.mxu0 %vm1254_vm5, %v1785_v49 }
 0x3db   : > { %1324 = vmatmul.mubr.bf16.gmra.mrb[36].mxu0 %v1787_v50 }
 0x496   : > { %v1301_v52 = vpop.f32.mrb[24].mxu0 }
 0x497   : > { %v1303_v53 = vpop.f32.mrb[25].mxu0  ;;  %v1302_v55 = vadd.f32 %v1527_v51, %v1301_v52 }
 0x498   : > { %v1304_v54 = vpop.f32.mrb[26].mxu0 }
 0x499   : > { %v1305_v56 = vadd.f32 %v1527_v51, %v1304_v54  ;;  %v1306_v57 = vpop.f32.mrb[27].mxu0 }
 0x49b   : > { %v1332_v58 = vpack.c.bf16 %v1305_v56, %v1302_v55 }
 0x49d   : > { %1788 = vtanh.bf16 %v1332_v58 }
 0x49e   : > { %v1309_v59 = vpop.f32.mrb[28].mxu0 }
 0x49f   : > { %v1311_v61 = vpop.f32.mrb[29].mxu0  ;;  %v1310_v63 = vadd.f32 %v1527_v51, %v1309_v59 }
 0x4a0   : > { %v1312_v62 = vpop.f32.mrb[30].mxu0 }
 0x4a1   : > { %v1313_v0 = vadd.f32 %v1527_v51, %v1312_v62  ;;  %v1314_v1 = vpop.f32.mrb[31].mxu0 }
 0x4a3   : > { %v1333_v2 = vpack.c.bf16 %v1313_v0, %v1310_v63 }
 0x4a5   : > { %1790 = vtanh.bf16 %v1333_v2 }
 0x4a6   : > { %v1317_v3 = vpop.f32.mrb[32].mxu0 }
 0x4a7   : > { %v1319_v4 = vpop.f32.mrb[33].mxu0  ;;  %v1318_v11 = vadd.f32 %v1527_v51, %v1317_v3 }
 0x4a8   : > { %v1789_v7 = vpop.eup %1788  ;;  %v1320_v9 = vpop.f32.mrb[34].mxu0 }
 0x4a9   : > { %v1542_v10 = vcombine.low %v1789_v7, %v1789_v7  ;;  %v1543_v60 = vcombine.high %v1789_v7, %v1789_v7  ;;  %v1321_v12 = vadd.f32 %v1527_v51, %v1320_v9  ;;  %v1322_v13 = vpop.f32.mrb[35].mxu0 }
 0x4ab   : > { %1368 = vst [vmem:[%s2229_s14] sm:$0xf] %v1542_v10  ;;  %1369 = vst [vmem:[%s2229_s14 + $0x4] sm:$0xf] %v1543_v60  ;;  %v1334_v14 = vpack.c.bf16 %v1321_v12, %v1318_v11 }
 0x4ad   : > { %1792 = vtanh.bf16 %v1334_v14 }
 0x4ae   : > { %v1325_v15 = vpop.f32.mrb[36].mxu0 }
 0x4af   : > { %v1327_v16 = vpop.f32.mrb[37].mxu0  ;;  %v1326_v20 = vadd.f32 %v1527_v51, %v1325_v15 }
 0x4b0   : > { %v1791_v17 = vpop.eup %1790  ;;  %v1328_v18 = vpop.f32.mrb[38].mxu0 }
 0x4b1   : > { %v1544_v19 = vcombine.low %v1791_v17, %v1791_v17  ;;  %v1545_v6 = vcombine.high %v1791_v17, %v1791_v17  ;;  %v1329_v21 = vadd.f32 %v1527_v51, %v1328_v18  ;;  %v1330_v5 = vpop.f32.mrb[39].mxu0 }
 0x4b3   : > { %1370 = vst [vmem:[%s2229_s14 + $0x8] sm:$0xf] %v1544_v19  ;;  %1371 = vst [vmem:[%s2229_s14 + $0xc] sm:$0xf] %v1545_v6  ;;  %v1335_v8 = vpack.c.bf16 %v1329_v21, %v1326_v20 }
 0x4b5   : > { %1794 = vtanh.bf16 %v1335_v8 }
 0x4b8   : > { %v1793_v22 = vpop.eup %1792 }
 0x4b9   : > { %v1546_v23 = vcombine.low %v1793_v22, %v1793_v22  ;;  %v1547_v24 = vcombine.high %v1793_v22, %v1793_v22 }
 0x4bb   : > { %1372 = vst [vmem:[%s2229_s14 + $0x10] sm:$0xf] %v1546_v23  ;;  %1373 = vst [vmem:[%s2229_s14 + $0x14] sm:$0xf] %v1547_v24 }
 0x4c0   : > { %v1795_v25 = vpop.eup %1794 }
 0x4c1   : > { %v1548_v26 = vcombine.low %v1795_v25, %v1795_v25  ;;  %v1549_v27 = vcombine.high %v1795_v25, %v1795_v25 }
 0x4c3   : > { %1374 = vst [vmem:[%s2229_s14 + $0x18] sm:$0xf] %v1548_v26  ;;  %1375 = vst [vmem:[%s2229_s14 + $0x1c] sm:$0xf] %v1549_v27 }
 0x4c4   : > { %1809 = shalt.err (!%p1806_p3)
}
 0x4c5   : > { %s1810_s30 = scalar_lea.hbm %s2242_s22, 512  ;;  %s1814_s15 = scalar_lea.hbm %s2302_s11, 1024 }
 0x4c6   : > { %p1811_p4 = scmp.ne.s32.totalorder %s2242_s22, %s1810_s30  ;;  %p1815_p9 = scmp.lt.u32.totalorder %s2242_s22, %s2302_s11 }
 0x4c7   : > { %p1816_p10 = scmp.lt.u32.totalorder %s1814_s15, %s1810_s30  ;;  %p1818_p12 = scmp.lt.u32.totalorder %s1810_s30, %s2242_s22 }
 0x4c8   : > { %p1812_p7 = pnand %p1811_p4, %p1963_p5 }
 0x4c9   : > { %p1817_p11 = por %p1816_p10, %p1815_p9 }
 0x4ca   : > { %p1813_p8 = pneg %p1812_p7 }
 0x4cb   : > { %p1819_p13 = por %p1818_p12, %p1817_p11 }
 0x4cd   : > { %p1820_p0 = pnand %p1819_p13, %p1813_p8 }
 0x4cf   : > { %1823 = shalt.err (!%p1820_p0)
}
 0x4d0   : > { %s1863_s21 = smov 64   ;;  %s1864_s29 = smov 4  }
 0x4d1   : > { %1611 = dma.vmem_to_hbm [thread:$0]  (%p1963_p5), %s2244_s12, 512, %s2242_s22, %s2250_s24, %s1863_s21, %s1863_s21, %s1864_s29  }
 0x4d2 PF: > { %p1617_p1 = scmp.ge.s32.totalorder %s1858_s20, 2  ;;  %s1405_s13 = sand.u32 1, %s1846_s17  }
 0x4d3   : > { %s1406_s30 = scalar_lea.sflag [#allocation3], %s1405_s13 }
 0x4d4   : > { %p1614_p2 = pnand %p1617_p1, %p1967_p6 }
 0x4d6   : > { %1841 = dma.done.wait (!%p1614_p2), %s1406_s30, 512  }
 0x4d7   : > { %1843 = vsyncadd (!%p1614_p2), %s1406_s30, 4294966784  ;;  %s2306_s14 = sld [smem:[#allocation5_spill]]  ;;  %p21_p3 = scmp.ge.s32.totalorder %s1950_s23, 4  }
 0x4d8   : > { %s2307_s17 = smov %s1850_s18  ;;  %s2308_s18 = smov %s1854_s19 }
 0x4d9   : > { %s2310_s20 = smov %s1950_s23  ;;  %23 = sbr.rel (!%p21_p3) target bundleno = 3 (0x3), region = 99 }
 0x4dd   : > { %s2309_s19 = smov %s2306_s14 }
 0x4e0   :  { %1411 = vsyncpa [#allocation3], 1 }
 0x4e1   :  { %1413 = vsyncpa [#allocation3 + $0x1], 1 }

</bundles_post_ra>
